<compile_context>
chip_gen: v7x
topology: tpu7x:2x2x1
jax: 0.10.0
libtpu: 0.0.40
codegen_flags: <defaults>
</compile_context>

<pallas_src>
import functools

import jax
import jax.numpy as jnp
from jax.experimental import pallas as pl
from jax.experimental.pallas import tpu as pltpu


def _conv_glu_kernel(x_ref, w_ref, b_ref, o_ref, *, m_half):
    """Fused Conv1d(+bias) + GLU for one lane-tile of nodes.

    x_ref: (Cin*T,        block_n)   input columns (one column per node)
    w_ref: (2*Cout*T_out, Cin*T)     banded conv weight (both GLU halves fused)
    b_ref: (2*Cout*T_out, 1)         f32 bias (conv bias repeated over T_out)
    o_ref: (Cout*T_out,   block_n)   lane-dense output tile
    """
    # Single 2D MXU push per grid step; f32 accumulation.
    acc = jnp.dot(w_ref[...], x_ref[...], preferred_element_type=jnp.float32)
    acc = acc + b_ref[...]                       # (M, 1) broadcast along lanes

    lin = acc[:m_half, :]                        # linear half   (d in [0, Cout))
    gate = acc[m_half:, :]                       # gate half     (d in [Cout, 2*Cout))
    o_ref[...] = (lin * jax.nn.sigmoid(gate)).astype(o_ref.dtype)


def _round_up(v, m):
    return -(-v // m) * m


def _sublane_multiple(itemsize):
    # f32 -> 8, bf16 -> 16, int8/fp8 -> 32
    return max(8, 32 // max(int(itemsize), 1))


def time1d_conv_glu(x_nct, weight, bias, *, block_n=None):
    """x_nct: (N, Cin, T)   weight: (2*Cout, Cin, k)   bias: (2*Cout,)
    Returns (N, Cout, T - k + 1), matching the PyTorch module's output."""
    n, cin, t = x_nct.shape
    c2, cin_w, k = weight.shape
    assert cin_w == cin and c2 % 2 == 0
    cout = c2 // 2
    t_out = t - k + 1
    assert t_out > 0

    compute_dtype = x_nct.dtype        # deliberate: weights quantized once, here
    k_dim = cin * t                    # contraction dim of the fused matmul
    m_all = c2 * t_out                 # rows of the fused weight (both GLU halves)
    m_half = cout * t_out

    # ---- wrapper-side relayout: x (N, Cin, T) -> (Cin*T, N), N on lanes -----
    x_kn = jnp.transpose(x_nct, (1, 2, 0)).reshape(k_dim, n).astype(compute_dtype)

    # ---- fold the k-tap conv into a banded (Toeplitz) weight ----------------
    #   W_big[(d, t), (c, s)] = W[d, c, s - t]  if 0 <= s - t < k  else 0
    # so the whole conv (and both GLU halves) is one 2D matmul in the kernel.
    tt = jnp.arange(t_out)[:, None]
    ss = jnp.arange(t)[None, :]
    tau = ss - tt                                               # (T_out, T)
    valid = (tau >= 0) & (tau < k)
    w_gath = jnp.take(weight, jnp.clip(tau, 0, k - 1), axis=2)  # (2C, Cin, T_out, T)
    w_big = jnp.where(valid[None, None], w_gath, 0.0)
    w_big = jnp.transpose(w_big, (0, 2, 1, 3)).reshape(m_all, k_dim)
    w_big = w_big.astype(compute_dtype)
    b_big = jnp.repeat(bias.astype(jnp.float32), t_out).reshape(m_all, 1)

    # ---- generation-aware VMEM budget & padding-aware block_n ---------------
    try:
        vmem_cap = int(pltpu.get_tpu_info().vmem_capacity_bytes)
    except Exception:
        vmem_cap = 64 * 1024 * 1024                 # safe floor (v7x per-TC size)
    vmem_limit = min(vmem_cap * 3 // 4, 100 * 1024 * 1024)   # v7x ~48MiB, v5e/v6e ~96MiB
    budget = vmem_limit * 4 // 5                    # headroom for compiler scratch

    isz = jnp.dtype(compute_dtype).itemsize
    sub = _sublane_multiple(isz)
    # Per-lane footprint with (sub,128) tile padding: double-buffered x block,
    # double-buffered out block, plus f32 accumulator + GLU temporaries.
    per_lane = (2 * _round_up(k_dim, sub) * isz
                + 2 * _round_up(m_half, sub) * isz
                + 3 * _round_up(m_all, 8) * 4)
    fixed = (2 * _round_up(m_all, sub) * _round_up(k_dim, 128) * isz   # resident W_big
             + 2 * _round_up(m_all, 8) * 128 * 4)                      # resident bias

    if block_n is None:
        if n <= 128:
            block_n = n
        else:
            lanes = max(128, (budget - fixed) // max(per_lane, 1))
            lanes = (lanes // 128) * 128
            block_n = int(min(lanes, max(128, (n // 128) * 128)))
    block_n = int(block_n)
    if block_n >= n:
        block_n = n
    elif block_n % 128 != 0:
        # keep the lane axis 128-aligned whenever we actually tile N
        block_n = max(128, (block_n // 128) * 128)
        if block_n >= n:
            block_n = n

    grid = (pl.cdiv(n, block_n),)
    kernel = functools.partial(_conv_glu_kernel, m_half=m_half)

    out_flat = pl.pallas_call(
        kernel,
        out_shape=jax.ShapeDtypeStruct((m_half, n), x_nct.dtype),
        grid=grid,
        in_specs=[
            pl.BlockSpec((k_dim, block_n), lambda i: (0, i)),   # x: streamed, lane-dense
            pl.BlockSpec((m_all, k_dim), lambda i: (0, 0)),     # W_big: resident
            pl.BlockSpec((m_all, 1), lambda i: (0, 0)),         # bias: resident
        ],
        out_specs=pl.BlockSpec((m_half, block_n), lambda i: (0, i)),
        compiler_params=pltpu.CompilerParams(
            dimension_semantics=("parallel",),
            vmem_limit_bytes=int(vmem_limit),
        ),
    )(x_kn, w_big, b_big)

    # (Cout*T_out, N) -> (N, Cout, T_out): the one cheap layout transpose, in XLA.
    return jnp.transpose(out_flat.reshape(cout, t_out, n), (2, 0, 1))


def _reference(x_nct, weight, bias):
    """Pure-JAX reference matching torch: F.glu(Conv1d(x), dim=1)."""
    n, cin, t = x_nct.shape
    c2, _, k = weight.shape
    cout = c2 // 2
    t_out = t - k + 1
    x = x_nct.astype(jnp.float32)
    acc = jnp.zeros((n, c2, t_out), jnp.float32)
    for tau in range(k):
        acc += jnp.einsum("nct,dc->ndt", x[:, :, tau:tau + t_out],
                          weight[:, :, tau].astype(jnp.float32))
    acc += bias.astype(jnp.float32)[None, :, None]
    out = acc[:, :cout] * jax.nn.sigmoid(acc[:, cout:])
    return out.astype(x_nct.dtype)


if __name__ == "__main__":
    # Small shapes consistent with the module (N nodes, T time steps, Cin/Cout, k).
    n_spatial = 256              # N  (256 so the N-tiled pipeline has >1 grid step)
    n_temporal = 12              # T
    channel_inputs = 4           # Cin
    channel_outputs = 8          # Cout
    time_convolution_length = 3  # k

    key = jax.random.PRNGKey(0)
    kx, kw, kb = jax.random.split(key, 3)

    # Parameter init consistent with torch.nn.Conv1d(Cin, 2*Cout, k).
    fan_in = channel_inputs * time_convolution_length
    bound = 1.0 / (fan_in ** 0.5)
    weight = jax.random.uniform(
        kw, (2 * channel_outputs, channel_inputs, time_convolution_length),
        dtype=jnp.float32, minval=-bound, maxval=bound)
    bias = jax.random.uniform(
        kb, (2 * channel_outputs,), dtype=jnp.float32, minval=-bound, maxval=bound)

    # Input in PyTorch layout (N, Cin, T).
    x = jax.random.normal(kx, (n_spatial, channel_inputs, n_temporal), dtype=jnp.float32)

    t_out = n_temporal - time_convolution_length + 1
    ref = _reference(x, weight, bias)

    # Explicit block_n=128 -> grid=(2,): exercises the lane-tiled pipeline.
    run = jax.jit(lambda a, w, b: time1d_conv_glu(a, w, b, block_n=128))
    out = jax.block_until_ready(run(x, weight, bias))
    assert out.shape == (n_spatial, channel_outputs, t_out), out.shape
    assert jnp.allclose(out, ref, atol=1e-5, rtol=1e-5), "mismatch vs reference (tiled)"

    # Auto block_n path (padding-aware / generation-aware sizing).
    out_auto = jax.block_until_ready(time1d_conv_glu(x, weight, bias))
    assert jnp.allclose(out_auto, ref, atol=1e-5, rtol=1e-5), "mismatch vs reference (auto)"

    print("KERNEL_OK")
</pallas_src>

<mosaic_0001>
module attributes {stable_mosaic.version = 11 : i64} {
  func.func @_conv_glu_kernel(%arg0: i32, %arg1: memref<48x128xf32, #tpu.memory_space<vmem>>, %arg2: memref<160x48xf32, #tpu.memory_space<vmem>>, %arg3: memref<160x1xf32, #tpu.memory_space<vmem>>, %arg4: memref<80x128xf32, #tpu.memory_space<vmem>>) attributes {dimension_semantics = [#tpu.dimension_semantics<parallel>], iteration_bounds = array<i64: 2>, scalar_prefetch = 0 : i64, scratch_operands = 0 : i64, tpu.core_type = #tpu.core_type<tc>, window_params = [{transform_indices = @transform_0, window_bounds = array<i64: 48, 128>}, {pipeline_mode = #tpu.pipeline_mode<synchronous>, transform_indices = @transform_1, window_bounds = array<i64: 160, 48>}, {pipeline_mode = #tpu.pipeline_mode<synchronous>, transform_indices = @transform_2, window_bounds = array<i64: 160, 1>}, {transform_indices = @transform_3, window_bounds = array<i64: 80, 128>}]} {
    %c0 = arith.constant 0 : index
    %c0_0 = arith.constant 0 : index
    %0 = vector.load %arg2[%c0, %c0_0] : memref<160x48xf32, #tpu.memory_space<vmem>>, vector<160x48xf32>
    %c0_1 = arith.constant 0 : index
    %c0_2 = arith.constant 0 : index
    %1 = vector.load %arg1[%c0_1, %c0_2] : memref<48x128xf32, #tpu.memory_space<vmem>>, vector<48x128xf32>
    %cst = arith.constant dense<0.000000e+00> : vector<160x128xf32>
    %2 = tpu.matmul %0, %1, %cst {dimension_numbers = #tpu.dot_dimension_numbers<[1], [0], [0], [1], [0, 0, 1, 1], [], []>} : vector<160x48xf32>, vector<48x128xf32>, vector<160x128xf32> -> vector<160x128xf32>
    %c0_3 = arith.constant 0 : index
    %c0_4 = arith.constant 0 : index
    %3 = vector.load %arg3[%c0_3, %c0_4] : memref<160x1xf32, #tpu.memory_space<vmem>>, vector<160x1xf32>
    %4 = vector.broadcast %3 : vector<160x1xf32> to vector<160x128xf32>
    %5 = arith.addf %2, %4 : vector<160x128xf32>
    %6 = vector.extract_strided_slice %5 {offsets = [0, 0], sizes = [80, 128], strides = [1, 1]} : vector<160x128xf32> to vector<80x128xf32>
    %7 = vector.extract_strided_slice %5 {offsets = [80, 0], sizes = [80, 128], strides = [1, 1]} : vector<160x128xf32> to vector<80x128xf32>
    %8 = arith.negf %7 : vector<80x128xf32>
    %9 = math.exp %8 : vector<80x128xf32>
    %cst_5 = arith.constant 1.000000e+00 : f32
    %10 = vector.broadcast %cst_5 : f32 to vector<80x128xf32>
    %11 = arith.addf %10, %9 : vector<80x128xf32>
    %12 = arith.divf %10, %11 : vector<80x128xf32>
    %13 = arith.mulf %6, %12 : vector<80x128xf32>
    %c0_6 = arith.constant 0 : index
    %c0_7 = arith.constant 0 : index
    %14 = vector.load %arg4[%c0_6, %c0_7] : memref<80x128xf32, #tpu.memory_space<vmem>>, vector<80x128xf32>
    tpu.vector_store %arg4[%c0_6, %c0_7], %13 {strides = array<i32>} : memref<80x128xf32, #tpu.memory_space<vmem>>, vector<80x128xf32>,
    return
  }
  func.func @transform_0(%arg0: i32) -> (i32, i32) {
    %c0_i32 = arith.constant 0 : i32
    %c0_i32_0 = arith.constant 0 : i32
    return %c0_i32, %arg0 : i32, i32
  }
  func.func @transform_1(%arg0: i32) -> (i32, i32) {
    %c0_i32 = arith.constant 0 : i32
    %c0_i32_0 = arith.constant 0 : i32
    %c0_i32_1 = arith.constant 0 : i32
    return %c0_i32, %c0_i32_0 : i32, i32
  }
  func.func @transform_2(%arg0: i32) -> (i32, i32) {
    %c0_i32 = arith.constant 0 : i32
    %c0_i32_0 = arith.constant 0 : i32
    %c0_i32_1 = arith.constant 0 : i32
    return %c0_i32, %c0_i32_0 : i32, i32
  }
  func.func @transform_3(%arg0: i32) -> (i32, i32) {
    %c0_i32 = arith.constant 0 : i32
    %c0_i32_0 = arith.constant 0 : i32
    return %c0_i32, %arg0 : i32, i32
  }
}

</mosaic_0001>

<bundles_post_ra>
// kernel: _lambda_.1
= control target key start
LH: loop header
LB: loop body
LE: loop exit
PB: predicated region body
PF: predicated region fallthrough
CT: control target
= control target key end

     0   :  { %s1044_s12 = smov 0   ;;  %s1046_s13 = smov 0   ;;  %s1300_s0 = inlined_call_operand.vmem [shape: f32[48,256], index: 0, kind: input, shape index: {}]   ;;  %s1301_s1 = inlined_call_operand.vmem [shape: f32[160,48], index: 1, kind: input, shape index: {}]   ;;  %s1302_s2 = inlined_call_operand.vmem [shape: f32[160,1], index: 2, kind: input, shape index: {}]   ;;  %s1303_s3 = inlined_call_operand.vmem [shape: f32[80,256], index: 3, kind: output, shape index: {}]  }
   0x1   :  { %s1048_s14 = smov 0  }
   0x2 LB: > { %s804_s15 = sadd.s32 4294967295, %s1021_s14   ;;  %s1061_s16 = sadd.s32 1, %s1021_s14   ;;  %s1021_s14 = sphi %s1048_s14, %s1307_s14   ;;  %s1017_s13 = sphi %s1046_s13, %s1306_s13   ;;  %s1013_s12 = sphi %s1044_s12, %s1305_s12  }
   0x3   : > { %s17_s17 = ssub.s32 %s1021_s14, %s1061_s16  ;;  %s20_s18 = sadd.s32 1, %s1017_s13 }
   0x4   : > { %p18_p0 = scmp.eq.s32.totalorder %s17_s17, 0  ;;  %p27_p1 = scmp.ne.s32.totalorder %s1017_s13, %s1013_s12 }
   0x5   : > { %p28_p2 = scmp.eq.s32.totalorder %s1021_s14, 0  ;;  %p99_p3 = scmp.eq.s32.totalorder %s804_s15, 1 }
   0x6   : > { %s1072_s19 = scalar_select %p18_p0, %s1017_s13, %s20_s18  }
   0x7   : > { %p29_p4 = por %p28_p2, %p27_p1  ;;  %p1074_p5 = por %p99_p3, %p27_p1 }
   0x8   : > { %p807_p6 = scmp.ge.s32.totalorder %s1021_s14, 2 }
   0xa   : > { %127 = sbr.rel (%p807_p6) target bundleno = 24 (0x18), region = 24 }
  0x11   : > { %130 = sbr.rel (!%p29_p4) target bundleno = 24 (0x18), region = 28  ;;  %s132_s21 = sand.u32 (%p29_p4), 1, %s1017_s13  }
  0x12   : > { %s808_s22 = sshll.u32 (%p29_p4), %s1021_s14, 3  ;;  %s929_s23 = smul.u32 (%p29_p4), 48, %s132_s21 }
  0x13   : > { %s136_s26 = scalar_lea.vmem (%p29_p4), %s1300_s0, %s808_s22 }
  0x14   : > { %v174_v0 = vld [vmem:[%s136_s26] sm:$0xff] (%p29_p4)  ;;  %v176_v1 = vld [vmem:[%s136_s26 + $0x10] sm:$0xff] (%p29_p4)  ;;  %s134_s27 = scalar_lea.vmem (%p29_p4), [#allocation2], %s929_s23 }
  0x15   : > { %v178_v2 = vld [vmem:[%s136_s26 + $0x20] sm:$0xff] (%p29_p4)  ;;  %v180_v3 = vld [vmem:[%s136_s26 + $0x30] sm:$0xff] (%p29_p4)  ;;  %175 = vst [vmem:[%s134_s27] sm:$0xff] (%p29_p4), %v174_v0  ;;  %177 = vst [vmem:[%s134_s27 + $0x8] sm:$0xff] (%p29_p4), %v176_v1 }
  0x16   : > { %v182_v4 = vld [vmem:[%s136_s26 + $0x40] sm:$0xff] (%p29_p4)  ;;  %v184_v5 = vld [vmem:[%s136_s26 + $0x50] sm:$0xff] (%p29_p4)  ;;  %179 = vst [vmem:[%s134_s27 + $0x10] sm:$0xff] (%p29_p4), %v178_v2  ;;  %181 = vst [vmem:[%s134_s27 + $0x18] sm:$0xff] (%p29_p4), %v180_v3 }
  0x17   : > { %183 = vst [vmem:[%s134_s27 + $0x20] sm:$0xff] (%p29_p4), %v182_v4  ;;  %185 = vst [vmem:[%s134_s27 + $0x28] sm:$0xff] (%p29_p4), %v184_v5 }
  0x18 PF: > { %p809_p7 = scmp.ge.s32.totalorder %s1021_s14, 1  ;;  %p190_p8 = scmp.lt.s32.totalorder %s1021_s14, 3 }
  0x1a   : > { %p191_p9 = pnand %p809_p7, %p190_p8 }
  0x1b   : > { %s197_s28 = sand.u32 (!%p191_p9), 1, %s1013_s12   ;;  %v219_v6 = vld [vmem:[%s1301_s1] sm:$0xff] (!%p191_p9)  ;;  %vm365_vm0 = vcmask (!%p191_p9), 392192   ;;  %v229_v7 = vld [vmem:[%s1301_s1 + $0x50] sm:$0xff] (!%p191_p9)  ;;  %v1023_v8 = vmov (!%p191_p9), 0   ;;  %v258_v20 = vld [vmem:[%s1302_s2 + $0x68] sm:$0xff] (!%p191_p9) }
  0x1c   : > { %194 = sbr.rel (%p191_p9) target bundleno = 318 (0x13e), region = 66  ;;  %881 = vmatprep.mubr.msk.f32.mxu0 (!%p191_p9), %vm365_vm0, %v219_v6  ;;  %896 = vmatprep.mubr.msk.f32.mxu1 (!%p191_p9), %vm365_vm0, %v229_v7  ;;  %v257_v17 = vld [vmem:[%s1302_s2 + $0x60] sm:$0xff] (!%p191_p9)  ;;  %v255_v19 = vld [vmem:[%s1302_s2 + $0x50] sm:$0xff] (!%p191_p9)  ;;  %v256_v21 = vld [vmem:[%s1302_s2 + $0x58] sm:$0xff] (!%p191_p9) }
  0x1d   : > { %s930_s6 = smul.u32 (!%p191_p9), 48, %s197_s28  ;;  %958 = vset.pattern.permute.xlu1 (!%p191_p9), %v1023_v8  ;;  %957 = vset.pattern.permute.xlu0 (!%p191_p9), %v1023_v8  ;;  %v260_v22 = vld [vmem:[%s1302_s2 + $0x78] sm:$0xff] (!%p191_p9)  ;;  %v259_v23 = vld [vmem:[%s1302_s2 + $0x70] sm:$0xff] (!%p191_p9)  ;;  %v220_v24 = vld [vmem:[%s1301_s1 + $0x8] sm:$0xff] (!%p191_p9) }
  0x1e   : > { %327 = vperm.xlu1 (!%p191_p9), %958, %v257_v17   ;;  %317 = vperm.xlu0 (!%p191_p9), %957, %v255_v19   ;;  %v230_v25 = vld [vmem:[%s1301_s1 + $0x58] sm:$0xff] (!%p191_p9)  ;;  %v221_v26 = vld [vmem:[%s1301_s1 + $0x10] sm:$0xff] (!%p191_p9)  ;;  %v231_v27 = vld [vmem:[%s1301_s1 + $0x60] sm:$0xff] (!%p191_p9)  ;;  %s931_s8 = smul.u32 (!%p191_p9), 80, %s197_s28 }
  0x1f   : > { %s199_s7 = scalar_lea.vmem (!%p191_p9), [#allocation2], %s930_s6  ;;  %v262_v28 = vld [vmem:[%s1302_s2 + $0x88] sm:$0xff] (!%p191_p9)  ;;  %v261_v29 = vld [vmem:[%s1302_s2 + $0x80] sm:$0xff] (!%p191_p9)  ;;  %v222_v30 = vld [vmem:[%s1301_s1 + $0x18] sm:$0xff] (!%p191_p9) }
  0x20   : > { %v239_v9 = vld [vmem:[%s199_s7] sm:$0xff] (!%p191_p9)  ;;  %v240_v10 = vld [vmem:[%s199_s7 + $0x8] sm:$0xff] (!%p191_p9)  ;;  %v241_v11 = vld [vmem:[%s199_s7 + $0x10] sm:$0xff] (!%p191_p9)  ;;  %s1253_s12 = scalar_lea.vmem (!%p191_p9), [#allocation3], %s931_s8 }
  0x21   : > { %v911_v12 = vpack.c.bf16 (!%p191_p9), %v240_v10, %v239_v9  ;;  %v242_v13 = vld [vmem:[%s199_s7 + $0x18] sm:$0xff] (!%p191_p9)  ;;  %v243_v15 = vld [vmem:[%s199_s7 + $0x20] sm:$0xff] (!%p191_p9)  ;;  %v244_v16 = vld [vmem:[%s199_s7 + $0x28] sm:$0xff] (!%p191_p9) }
  0x22   : > { %v915_v14 = vpack.c.bf16 (!%p191_p9), %v242_v13, %v241_v11  ;;  %v919_v18 = vpack.c.bf16 (!%p191_p9), %v244_v16, %v243_v15  ;;  %332 = vperm.xlu1 (!%p191_p9), %958, %v258_v20   ;;  %322 = vperm.xlu0 (!%p191_p9), %957, %v256_v21   ;;  %v232_v31 = vld [vmem:[%s1301_s1 + $0x68] sm:$0xff] (!%p191_p9)  ;;  %v223_v32 = vld [vmem:[%s1301_s1 + $0x20] sm:$0xff] (!%p191_p9)  ;;  %v233_v33 = vld [vmem:[%s1301_s1 + $0x70] sm:$0xff] (!%p191_p9) }
  0x23   : > { %912 = vmatprep.subr.bf16.mxu0 %v911_v12  ;;  %923 = vmatprep.subr.bf16.mxu1 %v911_v12  ;;  %v264_v34 = vld [vmem:[%s1302_s2 + $0x98] sm:$0xff]  ;;  %v263_v35 = vld [vmem:[%s1302_s2 + $0x90] sm:$0xff]  ;;  %v224_v36 = vld [vmem:[%s1301_s1 + $0x28] sm:$0xff]  ;;  %s840_s28 = sshll.u32 (%p1074_p5), %s804_s15, 3 }
  0x24   : > { %914 = vmatpush3.bf16.msra.mxu0 %v911_v12  ;;  %926 = vmatpush3.bf16.msra.mxu1 %v911_v12  ;;  %v234_v37 = vld [vmem:[%s1301_s1 + $0x78] sm:$0xff]  ;;  %v225_v38 = vld [vmem:[%s1301_s1 + $0x30] sm:$0xff]  ;;  %v235_v39 = vld [vmem:[%s1301_s1 + $0x80] sm:$0xff]  ;;  %s679_s20 = scalar_lea.vmem (%p1074_p5), %s1303_s3, %s840_s28 }
  0x25   : > { %916 = vmatprep.subr.bf16.mxu0 %v915_v14  ;;  %924 = vmatprep.subr.bf16.mxu1 %v915_v14  ;;  %v246_v40 = vld [vmem:[%s1302_s2 + $0x8] sm:$0xff]  ;;  %v245_v41 = vld [vmem:[%s1302_s2] sm:$0xff]  ;;  %v226_v42 = vld [vmem:[%s1301_s1 + $0x38] sm:$0xff] }
  0x26   : > { %342 = vperm.xlu1 %958, %v260_v22   ;;  %337 = vperm.xlu0 %957, %v259_v23   ;;  %v236_v43 = vld [vmem:[%s1301_s1 + $0x88] sm:$0xff]  ;;  %v227_v44 = vld [vmem:[%s1301_s1 + $0x40] sm:$0xff]  ;;  %v237_v45 = vld [vmem:[%s1301_s1 + $0x90] sm:$0xff] }
  0x27   : > { %v248_v46 = vld [vmem:[%s1302_s2 + $0x18] sm:$0xff]  ;;  %v247_v47 = vld [vmem:[%s1302_s2 + $0x10] sm:$0xff]  ;;  %v228_v48 = vld [vmem:[%s1301_s1 + $0x48] sm:$0xff] }
  0x28   : > { %918 = vmatpush3.bf16.msra.mxu0 %v915_v14  ;;  %927 = vmatpush3.bf16.msra.mxu1 %v915_v14  ;;  %v238_v49 = vld [vmem:[%s1301_s1 + $0x98] sm:$0xff]  ;;  %v250_v50 = vld [vmem:[%s1302_s2 + $0x28] sm:$0xff]  ;;  %v249_v51 = vld [vmem:[%s1302_s2 + $0x20] sm:$0xff] }
  0x29   : > { %920 = vmatprep.subr.bf16.mxu0 %v919_v18  ;;  %925 = vmatprep.subr.bf16.mxu1 %v919_v18  ;;  %v252_v52 = vld [vmem:[%s1302_s2 + $0x38] sm:$0xff]  ;;  %v251_v53 = vld [vmem:[%s1302_s2 + $0x30] sm:$0xff]  ;;  %v254_v54 = vld [vmem:[%s1302_s2 + $0x48] sm:$0xff] }
  0x2a   : > { %352 = vperm.xlu1 %958, %v262_v28   ;;  %347 = vperm.xlu0 %957, %v261_v29   ;;  %v253_v55 = vld [vmem:[%s1302_s2 + $0x40] sm:$0xff] }
  0x2c   : > { %922 = vmatpush3.bf16.msra.mxu0 %v919_v18  ;;  %928 = vmatpush3.bf16.msra.mxu1 %v919_v18 }
  0x2e   : > { %362 = vperm.xlu1 %958, %v264_v34   ;;  %357 = vperm.xlu0 %957, %v263_v35  }
  0x2f   : > { %882 = vmatmul.mubr.msk.f32.vlgmr.msra.gmra.mrb[0].mxu0 %vm365_vm0, %v220_v24  ;;  %897 = vmatmul.mubr.msk.f32.vlgmr.msra.gmra.mrb[0].mxu1 %vm365_vm0, %v230_v25 }
  0x30   : > { %884 = vmatprep.mubr.msk.f32.mxu0 %vm365_vm0, %v221_v26  ;;  %899 = vmatprep.mubr.msk.f32.mxu1 %vm365_vm0, %v231_v27 }
  0x32   : > { %272 = vperm.xlu1 %958, %v246_v40   ;;  %267 = vperm.xlu0 %957, %v245_v41  }
  0x33   : > { %885 = vmatmul.mubr.msk.f32.gmra.mrb[2].mxu0 %vm365_vm0, %v222_v30  ;;  %900 = vmatmul.mubr.msk.f32.gmra.mrb[2].mxu1 %vm365_vm0, %v232_v31 }
  0x34   : > { %887 = vmatprep.mubr.msk.f32.mxu0 %vm365_vm0, %v223_v32  ;;  %902 = vmatprep.mubr.msk.f32.mxu1 %vm365_vm0, %v233_v33 }
  0x36   : > { %282 = vperm.xlu1 %958, %v248_v46   ;;  %277 = vperm.xlu0 %957, %v247_v47  }
  0x37   : > { %888 = vmatmul.mubr.msk.f32.gmra.mrb[4].mxu0 %vm365_vm0, %v224_v36  ;;  %903 = vmatmul.mubr.msk.f32.gmra.mrb[4].mxu1 %vm365_vm0, %v234_v37 }
  0x38   : > { %890 = vmatprep.mubr.msk.f32.mxu0 %vm365_vm0, %v225_v38  ;;  %905 = vmatprep.mubr.msk.f32.mxu1 %vm365_vm0, %v235_v39 }
  0x3a   : > { %292 = vperm.xlu1 %958, %v250_v50   ;;  %287 = vperm.xlu0 %957, %v249_v51  }
  0x3b   : > { %891 = vmatmul.mubr.msk.f32.gmra.mrb[6].mxu0 %vm365_vm0, %v226_v42  ;;  %906 = vmatmul.mubr.msk.f32.gmra.mrb[6].mxu1 %vm365_vm0, %v236_v43 }
  0x3c   : > { %893 = vmatprep.mubr.msk.f32.mxu0 %vm365_vm0, %v227_v44  ;;  %908 = vmatprep.mubr.msk.f32.mxu1 %vm365_vm0, %v237_v45 }
  0x3e   : > { %302 = vperm.xlu1 %958, %v252_v52   ;;  %297 = vperm.xlu0 %957, %v251_v53  }
  0x3f   : > { %894 = vmatmul.mubr.msk.f32.gmra.mrb[8].mxu0 %vm365_vm0, %v228_v48  ;;  %909 = vmatmul.mubr.msk.f32.gmra.mrb[8].mxu1 %vm365_vm0, %v238_v49 }
  0x42   : > { %312 = vperm.xlu1 %958, %v254_v54   ;;  %307 = vperm.xlu0 %957, %v253_v55  }
  0x9d   : > { %v328_v56 = vpop.permute.xlu1 %327  ;;  %v318_v57 = vpop.permute.xlu0 %317 }
  0xa1   : > { %v333_v58 = vpop.permute.xlu1 %332  ;;  %v323_v59 = vpop.permute.xlu0 %322 }
  0xa5   : > { %v343_v60 = vpop.permute.xlu1 %342  ;;  %v338_v61 = vpop.permute.xlu0 %337 }
  0xa9   : > { %v353_v4 = vpop.permute.xlu1 %352  ;;  %v348_v13 = vpop.permute.xlu0 %347 }
  0xad   : > { %v363_v22 = vpop.permute.xlu1 %362  ;;  %v358_v32 = vpop.permute.xlu0 %357 }
  0xb1   : > { %v273_v43 = vpop.permute.xlu1 %272  ;;  %v268_v50 = vpop.permute.xlu0 %267 }
  0xb5   : > { %v283_v54 = vpop.permute.xlu1 %282 }
 0x102   : > { %v1229_v62 = vpop.f32.mrb[0].mxu0  ;;  %v898_v63 = vpop.f32.mrb[0].mxu1 }
 0x103   : > { %v548_v0 = vadd.f32 %v898_v63, %v323_v59  ;;  %v1231_v1 = vpop.f32.mrb[1].mxu0  ;;  %v542_v2 = vpop.f32.mrb[1].mxu1  ;;  %v498_v59 = vadd.f32 %v1229_v62, %v273_v43 }
 0x104   : > { %v543_v3 = vadd.f32 %v542_v2, %v318_v57 }
 0x105   : > { %v831_v5 = vmul.f32 -1.442695, %v548_v0 }
 0x106   : > { %v830_v6 = vmul.f32 -1.442695, %v543_v3  ;;  %v1233_v7 = vpop.f32.mrb[2].mxu0  ;;  %v901_v8 = vpop.f32.mrb[2].mxu1 }
 0x107   : > { %959 = vpow2.f32 %v831_v5  ;;  %v558_v9 = vadd.f32 %v901_v8, %v333_v58  ;;  %v1235_v10 = vpop.f32.mrb[3].mxu0  ;;  %v552_v11 = vpop.f32.mrb[3].mxu1  ;;  %v508_v62 = vadd.f32 %v1233_v7, %v283_v54 }
 0x108   : > { %961 = vpow2.f32 %v830_v6  ;;  %v553_v12 = vadd.f32 %v552_v11, %v328_v56  ;;  %v278_v58 = vpop.permute.xlu0 %277 }
 0x109   : > { %v833_v14 = vmul.f32 -1.442695, %v558_v9 }
 0x10a   : > { %v832_v15 = vmul.f32 -1.442695, %v553_v12  ;;  %v1237_v16 = vpop.f32.mrb[4].mxu0  ;;  %v904_v17 = vpop.f32.mrb[4].mxu1 }
 0x10b   : > { %963 = vpow2.f32 %v833_v14  ;;  %v568_v18 = vadd.f32 %v904_v17, %v343_v60  ;;  %v1239_v19 = vpop.f32.mrb[5].mxu0  ;;  %v562_v20 = vpop.f32.mrb[5].mxu1 }
 0x10c   : > { %965 = vpow2.f32 %v832_v15  ;;  %v563_v21 = vadd.f32 %v562_v20, %v338_v61  ;;  %v493_v61 = vadd.f32 %v1231_v1, %v268_v50  ;;  %v503_v1 = vadd.f32 %v1235_v10, %v278_v58 }
 0x10d   : > { %v835_v23 = vmul.f32 -1.442695, %v568_v18 }
 0x10e   : > { %v834_v24 = vmul.f32 -1.442695, %v563_v21  ;;  %v1241_v25 = vpop.f32.mrb[6].mxu0  ;;  %v907_v26 = vpop.f32.mrb[6].mxu1 }
 0x10f   : > { %967 = vpow2.f32 %v835_v23  ;;  %v578_v27 = vadd.f32 %v907_v26, %v353_v4  ;;  %v1243_v28 = vpop.f32.mrb[7].mxu0  ;;  %v572_v29 = vpop.f32.mrb[7].mxu1 }
 0x110   : > { %969 = vpow2.f32 %v834_v24  ;;  %v573_v30 = vadd.f32 %v572_v29, %v348_v13  ;;  %v293_v4 = vpop.permute.xlu1 %292  ;;  %v288_v13 = vpop.permute.xlu0 %287 }
 0x111   : > { %v960_v31 = vpop.eup %959  ;;  %v837_v33 = vmul.f32 -1.442695, %v578_v27  ;;  %v518_v18 = vadd.f32 %v1237_v16, %v293_v4  ;;  %v513_v10 = vadd.f32 %v1239_v19, %v288_v13 }
 0x112   : > { %v962_v34 = vpop.eup %961  ;;  %v622_v35 = vadd.f32 1.0, %v960_v31  ;;  %v836_v36 = vmul.f32 -1.442695, %v573_v30  ;;  %v1245_v37 = vpop.f32.mrb[8].mxu0 }
 0x113   : > { %v910_v38 = vpop.f32.mrb[8].mxu1  ;;  %v621_v39 = vadd.f32 1.0, %v962_v34  ;;  %971 = vpow2.f32 %v837_v33  ;;  %v1247_v41 = vpop.f32.mrb[9].mxu0 }
 0x114   : > { %v588_v40 = vadd.f32 %v910_v38, %v363_v22  ;;  %v582_v42 = vpop.f32.mrb[9].mxu1  ;;  %973 = vrcp.f32 %v622_v35  ;;  %v303_v21 = vpop.permute.xlu1 %302 }
 0x115   : > { %v583_v44 = vadd.f32 %v582_v42, %v358_v32  ;;  %v964_v45 = vpop.eup %963  ;;  %975 = vrcp.f32 %v621_v39  ;;  %v298_v26 = vpop.permute.xlu0 %297  ;;  %v528_v27 = vadd.f32 %v1241_v25, %v303_v21 }
 0x116   : > { %v839_v46 = vmul.f32 -1.442695, %v588_v40  ;;  %v966_v47 = vpop.eup %965  ;;  %v624_v48 = vadd.f32 1.0, %v964_v45  ;;  %977 = vpow2.f32 %v836_v36  ;;  %v523_v31 = vadd.f32 %v1243_v28, %v298_v26 }
 0x117   : > { %v838_v49 = vmul.f32 -1.442695, %v583_v44  ;;  %v623_v51 = vadd.f32 1.0, %v966_v47 }
 0x118   : > { %979 = vpow2.f32 %v839_v46  ;;  %v313_v30 = vpop.permute.xlu1 %312 }
 0x119   : > { %981 = vrcp.f32 %v624_v48  ;;  %v968_v52 = vpop.eup %967  ;;  %v538_v19 = vadd.f32 %v1245_v37, %v313_v30  ;;  %v308_v35 = vpop.permute.xlu0 %307 }
 0x11a   : > { %983 = vrcp.f32 %v623_v51  ;;  %v970_v53 = vpop.eup %969  ;;  %v626_v55 = vadd.f32 1.0, %v968_v52  ;;  %v533_v38 = vadd.f32 %v1247_v41, %v308_v35 }
 0x11b   : > { %985 = vpow2.f32 %v838_v49  ;;  %v625_v56 = vadd.f32 1.0, %v970_v53 }
 0x11c   : > { %987 = vrcp.f32 %v626_v55 }
 0x11d   : > { %v972_v57 = vpop.eup %971  ;;  %989 = vrcp.f32 %v625_v56 }
 0x11e   : > { %v974_v60 = vpop.eup %973  ;;  %v628_v63 = vadd.f32 1.0, %v972_v57 }
 0x11f   : > { %v976_v0 = vpop.eup %975  ;;  %v652_v2 = vmul.f32 %v974_v60, %v498_v59 }
 0x120   : > { %v978_v3 = vpop.eup %977  ;;  %v651_v5 = vmul.f32 %v976_v0, %v493_v61  ;;  %991 = vrcp.f32 %v628_v63 }
 0x121   : > { %662 = vst [vmem:[%s1253_s12 + $0x8] sm:$0xff] %v652_v2  ;;  %v627_v8 = vadd.f32 1.0, %v978_v3 }
 0x122   : > { %v980_v6 = vpop.eup %979  ;;  %661 = vst [vmem:[%s1253_s12] sm:$0xff] %v651_v5 }
 0x123   : > { %v982_v9 = vpop.eup %981  ;;  %v630_v11 = vadd.f32 1.0, %v980_v6  ;;  %993 = vrcp.f32 %v627_v8 }
 0x124   : > { %v984_v12 = vpop.eup %983  ;;  %v654_v14 = vmul.f32 %v982_v9, %v508_v62 }
 0x125   : > { %v986_v15 = vpop.eup %985  ;;  %v653_v17 = vmul.f32 %v984_v12, %v503_v1  ;;  %995 = vrcp.f32 %v630_v11 }
 0x126   : > { %664 = vst [vmem:[%s1253_s12 + $0x18] sm:$0xff] %v654_v14  ;;  %v629_v7 = vadd.f32 1.0, %v986_v15  ;;  %v988_v20 = vpop.eup %987 }
 0x127   : > { %663 = vst [vmem:[%s1253_s12 + $0x10] sm:$0xff] %v653_v17  ;;  %v990_v22 = vpop.eup %989  ;;  %v656_v23 = vmul.f32 %v988_v20, %v518_v18 }
 0x128   : > { %997 = vrcp.f32 %v629_v7  ;;  %v655_v24 = vmul.f32 %v990_v22, %v513_v10  ;;  %v727_v37 = vld [vmem:[%s1253_s12 + $0x8] sm:$0xff] (%p1074_p5) }
 0x129   : > { %666 = vst [vmem:[%s1253_s12 + $0x28] sm:$0xff] %v656_v23  ;;  %v725_v28 = vld [vmem:[%s1253_s12] sm:$0xff] (%p1074_p5)  ;;  %728 = vst [vmem:[%s679_s20 + $0x10] sm:$0xff] (%p1074_p5), %v727_v37 }
 0x12a   : > { %v992_v29 = vpop.eup %991  ;;  %665 = vst [vmem:[%s1253_s12 + $0x20] sm:$0xff] %v655_v24  ;;  %726 = vst [vmem:[%s679_s20] sm:$0xff] (%p1074_p5), %v725_v28 }
 0x12b   : > { %v658_v16 = vmul.f32 %v992_v29, %v528_v27 }
 0x12d   : > { %v994_v32 = vpop.eup %993  ;;  %668 = vst [vmem:[%s1253_s12 + $0x38] sm:$0xff] %v658_v16  ;;  %v731_v41 = vld [vmem:[%s1253_s12 + $0x18] sm:$0xff] (%p1074_p5) }
 0x12e   : > { %v657_v34 = vmul.f32 %v994_v32, %v523_v31  ;;  %v729_v40 = vld [vmem:[%s1253_s12 + $0x10] sm:$0xff] (%p1074_p5)  ;;  %732 = vst [vmem:[%s679_s20 + $0x30] sm:$0xff] (%p1074_p5), %v731_v41 }
 0x12f   : > { %v996_v33 = vpop.eup %995  ;;  %677 = sbr.rel (!%p1074_p5) target bundleno = 318 (0x13e), region = 74  ;;  %730 = vst [vmem:[%s679_s20 + $0x20] sm:$0xff] (%p1074_p5), %v729_v40 }
 0x130   : > { %v660_v36 = vmul.f32 %v996_v33, %v538_v19  ;;  %667 = vst [vmem:[%s1253_s12 + $0x30] sm:$0xff] %v657_v34  ;;  %v735_v43 = vld [vmem:[%s1253_s12 + $0x28] sm:$0xff] (%p1074_p5) }
 0x131   : > { %v733_v42 = vld [vmem:[%s1253_s12 + $0x20] sm:$0xff] (%p1074_p5)  ;;  %736 = vst [vmem:[%s679_s20 + $0x50] sm:$0xff] (%p1074_p5), %v735_v43 }
 0x132   : > { %v998_v25 = vpop.eup %997  ;;  %670 = vst [vmem:[%s1253_s12 + $0x48] sm:$0xff] %v660_v36  ;;  %734 = vst [vmem:[%s679_s20 + $0x40] sm:$0xff] (%p1074_p5), %v733_v42 }
 0x133   : > { %v659_v39 = vmul.f32 %v998_v25, %v533_v38 }
 0x134   : > { %v739_v45 = vld [vmem:[%s1253_s12 + $0x38] sm:$0xff] (%p1074_p5) }
 0x135   : > { %669 = vst [vmem:[%s1253_s12 + $0x40] sm:$0xff] %v659_v39  ;;  %740 = vst [vmem:[%s679_s20 + $0x70] sm:$0xff] (%p1074_p5), %v739_v45 }
 0x137   : > { %v737_v44 = vld [vmem:[%s1253_s12 + $0x30] sm:$0xff] }
 0x138   : > { %738 = vst [vmem:[%s679_s20 + $0x60] sm:$0xff] %v737_v44 }
 0x139   : > { %v743_v47 = vld [vmem:[%s1253_s12 + $0x48] sm:$0xff] }
 0x13a   : > { %744 = vst [vmem:[%s679_s20 + $0x90] sm:$0xff] %v743_v47 }
 0x13c   : > { %v741_v46 = vld [vmem:[%s1253_s12 + $0x40] sm:$0xff] }
 0x13d   : > { %742 = vst [vmem:[%s679_s20 + $0x80] sm:$0xff] %v741_v46 }
 0x13e PF: > { %p10_p10 = scmp.ge.s32.totalorder %s1061_s16, 4   ;;  %s1305_s12 = smov %s1017_s13 }
 0x13f   : > { %s1306_s13 = smov %s1072_s19  ;;  %s1307_s14 = smov %s1061_s16 }
 0x140   :  { %12 = sbr.rel (!%p10_p10) target bundleno = 2 (0x2), region = 143 }

</bundles_post_ra>
